<compile_context>
chip_gen: v5e
topology: v5e:2x2
jax: 0.10.0
libtpu: 0.0.40
codegen_flags: <defaults>
</compile_context>

<pallas_src>
import jax
import jax.numpy as jnp
from jax.experimental import pallas as pl
from jax.experimental.pallas import tpu as pltpu


def make_mymodule_kernel(const_add):
    """const_add = float(N) + 4.0, folded at trace time (y is a static int)."""

    def kernel(x_ref, w_ref, b_ref, o_ref):
        # x_ref: [CHW, TN] f32 (VMEM, lane-dense batch), w_ref: [CHW, 1] f32 (VMEM)
        # b_ref: [1] f32 (SMEM) conv bias
        x = x_ref[...]                                              # [CHW, TN]
        w = w_ref[...]                                              # [CHW, 1]
        # 3x3 valid conv on a 3x3 input == per-batch dot over all 27 taps.
        # VPU multiply + sublane reduce; keep K=27 off the MXU.
        conv = jnp.sum(x * w, axis=0, keepdims=True) + b_ref[0]     # [1, TN]
        # relu(conv(x) + 4 * z)   (conv broadcasts over sublanes)
        h = jnp.maximum(conv + 4.0 * x, 0.0)                        # [CHW, TN]
        # LeafModule: relu(h + y + z + 4), with (y + 4) pre-folded
        o_ref[...] = jnp.maximum(h + x + const_add, 0.0)

    return kernel


def mymodule_forward(x_nchw, w_conv, b_conv, *, tile_n=32768):
    """x_nchw: [N, 3, 3, 3] f32, w_conv: [1, 3, 3, 3] f32 (OIHW), b_conv: [1] f32."""
    N, C, H, W = x_nchw.shape
    assert (C, H, W) == (3, 3, 3), "module broadcast requires 3x3x3 input"

    # leaf_function(x.shape[0]) -> int(N): a trace-time constant; fold y + 4.
    const_add = float(N) + 4.0
    CHW = C * H * W

    # Lane-dense layout: batch on the lane (last) axis, the 27 conv taps on
    # the sublane axis.
    xt = x_nchw.reshape(N, CHW).T            # [CHW, N]
    wt = w_conv.reshape(1, CHW).T            # [CHW, 1]

    if N <= tile_n:
        # Single block; block shape == full array dims, so the (8,128) rule
        # is satisfied even for tiny N.  (At toy sizes the second v7x TC
        # idles -- unavoidable with one grid step.)
        tn = N
    else:
        # Lane-dense tile (multiple of 128).  (27, 32768) f32 ~ 3.4 MiB per
        # block; last block handled ragged by Pallas (no wrapper pad/slice).
        tn = tile_n
    grid = (pl.cdiv(N, tn),)

    out_t = pl.pallas_call(
        make_mymodule_kernel(const_add),
        out_shape=jax.ShapeDtypeStruct((CHW, N), x_nchw.dtype),
        grid=grid,
        in_specs=[
            pl.BlockSpec((CHW, tn), lambda i: (0, i)),
            pl.BlockSpec((CHW, 1), lambda i: (0, 0)),   # weight stays resident
            pl.BlockSpec(memory_space=pltpu.MemorySpace.SMEM),
        ],
        out_specs=pl.BlockSpec((CHW, tn), lambda i: (0, i)),
        compiler_params=pltpu.CompilerParams(
            dimension_semantics=("parallel",),
            # Budget: 2x(in block) + 2x(out block) + w  ~= 16 MiB at tile_n=32K
            # (sublane-padded); 48 MiB gives headroom and stays under v7x's
            # 64 MiB physical VMEM and above v5e's 16 MiB default scoped limit.
            vmem_limit_bytes=48 * 1024 * 1024,
        ),
    )(xt, wt, b_conv)

    return out_t.T.reshape(N, C, H, W)


def reference_forward(x, w, b):
    """Pure-JAX reference mirroring the PyTorch forward exactly."""
    N = x.shape[0]
    conv = jax.lax.conv_general_dilated(
        x, w, window_strides=(1, 1), padding="VALID",
        dimension_numbers=("NCHW", "OIHW", "NCHW"),
    ) + b.reshape(1, 1, 1, 1)                        # [N, 1, 1, 1]
    h = jnp.maximum(conv + 4.0 * x, 0.0)             # relu(conv + 4*z)
    return jnp.maximum(h + float(N) + x + 4.0, 0.0)  # relu(x + y + z + 4)


if __name__ == "__main__":
    key = jax.random.PRNGKey(0)
    kx, kw, kb = jax.random.split(key, 3)

    # Input: batch=2, channels=3, spatial=3x3 (forced by the module's broadcast)
    x = jax.random.normal(kx, (2, 3, 3, 3), dtype=jnp.float32)

    # Deterministic Conv2d(3, 1, 3) params, PyTorch-style U(-1/sqrt(fan_in), +)
    fan_in = 3 * 3 * 3
    bound = 1.0 / (fan_in ** 0.5)
    w_conv = jax.random.uniform(kw, (1, 3, 3, 3), jnp.float32, -bound, bound)
    b_conv = jax.random.uniform(kb, (1,), jnp.float32, -bound, bound)

    out = mymodule_forward(x, w_conv, b_conv)
    out = jax.block_until_ready(out)

    ref = reference_forward(x, w_conv, b_conv)
    assert out.shape == (2, 3, 3, 3)
    assert jnp.allclose(out, ref, atol=1e-5, rtol=1e-5), "mismatch vs reference"
    print("KERNEL_OK")
</pallas_src>

<mosaic_0001>
module attributes {stable_mosaic.version = 11 : i64} {
  func.func @kernel(%arg0: i32, %arg1: memref<27x2xf32, #tpu.memory_space<vmem>>, %arg2: memref<27x1xf32, #tpu.memory_space<vmem>>, %arg3: memref<1xf32, #tpu.memory_space<smem>>, %arg4: memref<27x2xf32, #tpu.memory_space<vmem>>) attributes {dimension_semantics = [#tpu.dimension_semantics<parallel>], iteration_bounds = array<i64: 1>, scalar_prefetch = 0 : i64, scratch_operands = 0 : i64, tpu.core_type = #tpu.core_type<tc>, window_params = [{transform_indices = @transform_0, window_bounds = array<i64: 27, 2>}, {pipeline_mode = #tpu.pipeline_mode<synchronous>, transform_indices = @transform_1, window_bounds = array<i64: 27, 1>}, {transform_indices = @transform_2, window_bounds = array<i64: 1>}, {transform_indices = @transform_3, window_bounds = array<i64: 27, 2>}]} {
    %c0 = arith.constant 0 : index
    %c0_0 = arith.constant 0 : index
    %0 = vector.load %arg1[%c0, %c0_0] : memref<27x2xf32, #tpu.memory_space<vmem>>, vector<27x2xf32>
    %c0_1 = arith.constant 0 : index
    %c0_2 = arith.constant 0 : index
    %1 = vector.load %arg2[%c0_1, %c0_2] : memref<27x1xf32, #tpu.memory_space<vmem>>, vector<27x1xf32>
    %2 = vector.broadcast %1 : vector<27x1xf32> to vector<27x2xf32>
    %3 = arith.mulf %0, %2 : vector<27x2xf32>
    %cst = arith.constant dense<0.000000e+00> : vector<2xf32>
    %4 = vector.multi_reduction <add>, %3, %cst [0] : vector<27x2xf32> to vector<2xf32>
    %5 = vector.shape_cast %4 : vector<2xf32> to vector<1x2xf32>
    %c0_3 = arith.constant 0 : index
    %6 = memref.load %arg3[%c0_3] : memref<1xf32, #tpu.memory_space<smem>>
    %7 = vector.broadcast %6 : f32 to vector<1x2xf32>
    %8 = arith.addf %5, %7 : vector<1x2xf32>
    %cst_4 = arith.constant 4.000000e+00 : f32
    %9 = vector.broadcast %cst_4 : f32 to vector<27x2xf32>
    %10 = arith.mulf %9, %0 : vector<27x2xf32>
    %11 = vector.broadcast %8 : vector<1x2xf32> to vector<27x2xf32>
    %12 = arith.addf %11, %10 : vector<27x2xf32>
    %cst_5 = arith.constant 0.000000e+00 : f32
    %13 = vector.broadcast %cst_5 : f32 to vector<27x2xf32>
    %14 = arith.maximumf %12, %13 : vector<27x2xf32>
    %15 = arith.addf %14, %0 : vector<27x2xf32>
    %cst_6 = arith.constant 6.000000e+00 : f32
    %16 = vector.broadcast %cst_6 : f32 to vector<27x2xf32>
    %17 = arith.addf %15, %16 : vector<27x2xf32>
    %cst_7 = arith.constant 0.000000e+00 : f32
    %18 = vector.broadcast %cst_7 : f32 to vector<27x2xf32>
    %19 = arith.maximumf %17, %18 : vector<27x2xf32>
    %c0_8 = arith.constant 0 : index
    %c0_9 = arith.constant 0 : index
    %20 = vector.load %arg4[%c0_8, %c0_9] : memref<27x2xf32, #tpu.memory_space<vmem>>, vector<27x2xf32>
    tpu.vector_store %arg4[%c0_8, %c0_9], %19 {strides = array<i32>} : memref<27x2xf32, #tpu.memory_space<vmem>>, vector<27x2xf32>,
    return
  }
  func.func @transform_0(%arg0: i32) -> (i32, i32) {
    %c0_i32 = arith.constant 0 : i32
    %c0_i32_0 = arith.constant 0 : i32
    return %c0_i32, %arg0 : i32, i32
  }
  func.func @transform_1(%arg0: i32) -> (i32, i32) {
    %c0_i32 = arith.constant 0 : i32
    %c0_i32_0 = arith.constant 0 : i32
    %c0_i32_1 = arith.constant 0 : i32
    return %c0_i32, %c0_i32_0 : i32, i32
  }
  func.func @transform_2(%arg0: i32) -> i32 {
    %c0_i32 = arith.constant 0 : i32
    %c0_i32_0 = arith.constant 0 : i32
    return %c0_i32 : i32
  }
  func.func @transform_3(%arg0: i32) -> (i32, i32) {
    %c0_i32 = arith.constant 0 : i32
    %c0_i32_0 = arith.constant 0 : i32
    return %c0_i32, %arg0 : i32, i32
  }
}

</mosaic_0001>

<bundles_post_ra>
// kernel: tpu_custom_call.1
= control target key start
LH: loop header
LB: loop body
LE: loop exit
PB: predicated region body
PF: predicated region fallthrough
CT: control target
= control target key end

     0   :  { %v100_v0 = vmov 0   ;;  %vm47_vm0 = vcmask 15360   ;;  %vm53_vm1 = vcmask 10240   ;;  %s168_s1 = inlined_call_operand.vmem [shape: f32[27,1], index: 1, kind: input, shape index: {}]   ;;  %s169_s0 = inlined_call_operand.vmem [shape: f32[27,2], index: 0, kind: input, shape index: {}]   ;;  %s170_s2 = inlined_call_operand.<no memory space> [shape: f32[1], index: 2, kind: input, shape index: {}]   ;;  %s171_s3 = inlined_call_operand.vmem [shape: f32[27,2], index: 3, kind: output, shape index: {}]  }
   0x1   :  { %99 = vset.pattern.permute.xlu1 %v100_v0  ;;  %98 = vset.pattern.permute.xlu0 %v100_v0  ;;  %v21_v1 = vld [vmem:[%s168_s1 + $0x10] sm:$0xff]  ;;  %v19_v2 = vld [vmem:[%s168_s1] sm:$0xff]  ;;  %v22_v3 = vld [vmem:[%s168_s1 + $0x18] sm:$0x7]  ;;  %v63_v30 = vstv %s170_s2 }
   0x2   :  { %35 = vperm.xlu1 %99, %v21_v1   ;;  %25 = vperm.xlu0 %98, %v19_v2   ;;  %v20_v4 = vld [vmem:[%s168_s1 + $0x8] sm:$0xff]  ;;  %v15_v7 = vld [vmem:[%s169_s0] sm:$0xff]  ;;  %v17_v8 = vld [vmem:[%s169_s0 + $0x10] sm:$0xff] }
   0x3   :  { %v16_v9 = vld [vmem:[%s169_s0 + $0x8] sm:$0xff]  ;;  %v18_v12 = vld [vmem:[%s169_s0 + $0x18] sm:$0x7]  ;;  %v67_v29 = vmul.f32 4.0, %v17_v8  ;;  %v65_v31 = vmul.f32 4.0, %v15_v7 }
   0x4   :  { %v68_v32 = vmul.f32 4.0, %v18_v12  ;;  %v66_v34 = vmul.f32 4.0, %v16_v9 }
   0xa   :  { %40 = vperm.xlu1 %99, %v22_v3   ;;  %30 = vperm.xlu0 %98, %v20_v4  }
  0x74   :  { %v36_v5 = vpop.permute.xlu1 %35  ;;  %v26_v6 = vpop.permute.xlu0 %25 }
  0x75   :  { %v43_v10 = vmul.f32 %v26_v6, %v15_v7  ;;  %v45_v14 = vmul.f32 %v36_v5, %v17_v8 }
  0x77   :  { %v48_v16 = vsel %vm47_vm0, %v43_v10, 0.0  ;;  %v51_v20 = vsel %vm47_vm0, %v45_v14, 0.0 }
  0x7c   :  { %v41_v11 = vpop.permute.xlu1 %40  ;;  %v31_v13 = vpop.permute.xlu0 %30 }
  0x7d   :  { %v44_v15 = vmul.f32 %v31_v13, %v16_v9  ;;  %v46_v17 = vmul.f32 %v41_v11, %v18_v12 }
  0x7f   :  { %v49_v18 = vsel %vm47_vm0, %v44_v15, 0.0  ;;  %v54_v22 = vsel %vm53_vm1, %v46_v17, 0.0 }
  0x80   :  { %v50_v19 = vadd.f32 %v49_v18, %v48_v16 }
  0x82   :  { %v52_v21 = vadd.f32 %v51_v20, %v50_v19 }
  0x84   :  { %v55_v23 = vadd.f32 %v54_v22, %v52_v21 }
  0x86   :  { %v56_v24 = vrot.slane %v55_v23, 4 }
  0x88   :  { %v57_v25 = vadd.f32 %v56_v24, %v55_v23 }
  0x8a   :  { %v58_v26 = vrot.slane %v57_v25, 2 }
  0x8c   :  { %v59_v27 = vadd.f32 %v58_v26, %v57_v25 }
  0x8e   :  { %v60_v28 = vrot.slane %v59_v27, 1 }
  0x90   :  { %v61_v33 = vadd.f32 %v60_v28, %v59_v27 }
  0x92   :  { %v64_v35 = vadd.f32 %v63_v30, %v61_v33 }
  0x94   :  { %v69_v36 = vadd.f32 %v65_v31, %v64_v35  ;;  %v70_v37 = vadd.f32 %v66_v34, %v64_v35  ;;  %v71_v38 = vadd.f32 %v67_v29, %v64_v35  ;;  %v72_v39 = vadd.f32 %v68_v32, %v64_v35 }
  0x96   :  { %v73_v40 = vmax.f32 %v69_v36, 0.0  ;;  %v74_v41 = vmax.f32 %v70_v37, 0.0  ;;  %v75_v42 = vmax.f32 %v71_v38, 0.0  ;;  %v76_v43 = vmax.f32 %v72_v39, 0.0 }
  0x98   :  { %v77_v44 = vadd.f32 %v73_v40, %v15_v7  ;;  %v78_v45 = vadd.f32 %v74_v41, %v16_v9  ;;  %v79_v46 = vadd.f32 %v75_v42, %v17_v8  ;;  %v80_v47 = vadd.f32 %v76_v43, %v18_v12 }
  0x9a   :  { %v81_v48 = vadd.f32 6.0, %v77_v44  ;;  %v82_v49 = vadd.f32 6.0, %v78_v45  ;;  %v83_v50 = vadd.f32 6.0, %v79_v46  ;;  %v84_v51 = vadd.f32 6.0, %v80_v47 }
  0x9c   :  { %v85_v52 = vmax.f32 %v81_v48, 0.0  ;;  %v86_v53 = vmax.f32 %v82_v49, 0.0  ;;  %v87_v54 = vmax.f32 %v83_v50, 0.0  ;;  %v88_v55 = vmax.f32 %v84_v51, 0.0 }
  0x9e   :  { %89 = vst.msk [vmem:[%s171_s3] sm:$0xff] %vm47_vm0, %v85_v52 }
  0x9f   :  { %90 = vst.msk [vmem:[%s171_s3 + $0x8] sm:$0xff] %vm47_vm0, %v86_v53 }
  0xa0   :  { %91 = vst.msk [vmem:[%s171_s3 + $0x10] sm:$0xff] %vm47_vm0, %v87_v54 }
  0xa1   :  { %92 = vst.msk [vmem:[%s171_s3 + $0x18] sm:$0x7] %vm53_vm1, %v88_v55 }

</bundles_post_ra>
